<compile_context>
chip_gen: v7x
topology: tpu7x:2x2x1
jax: 0.10.0
libtpu: 0.0.40
codegen_flags: <defaults>
</compile_context>

<pallas_src>
import jax
import jax.numpy as jnp
from jax.experimental import pallas as pl
from jax.experimental.pallas import tpu as pltpu

KSIZE = 7          # spatial-attention conv kernel (padding = KSIZE // 2)
REDUCTION = 2      # channel-attention MLP reduction ratio (small synthetic C)


def _cbam_kernel(x_ref, w1_ref, w2_ref, cm_ref, o_ref):
    """Fused CBAM for one batch element in lane-dense (C, H*W) layout.

    x_ref : (C, HW)      VMEM   feature block, spatial dims flattened
    w1_ref: (Cr, C)      VMEM   channel-MLP layer-1 weight
    w2_ref: (C, Cr)      VMEM   channel-MLP layer-2 weight
    cm_ref: (2, HW, HW)  VMEM   dense 7x7 conv matrices for the [avg, max] map
    o_ref : (C, HW)      VMEM   output block
    """
    x = x_ref[...]                                  # (C, HW), native dtype
    xf = x.astype(jnp.float32)

    # ---------------- channel attention ----------------
    # avg & max pooled vectors, batched through the shared MLP in ONE pass.
    avg = jnp.mean(xf, axis=1, keepdims=True)       # (C, 1)
    mx = jnp.max(xf, axis=1, keepdims=True)         # (C, 1)
    pooled = jnp.concatenate([avg, mx], axis=1)     # (C, 2)

    w1 = w1_ref[...].astype(jnp.float32)            # (Cr, C)
    w2 = w2_ref[...].astype(jnp.float32)            # (C, Cr)
    hid = jnp.maximum(
        jnp.dot(w1, pooled, preferred_element_type=jnp.float32), 0.0)   # (Cr, 2)
    att = jnp.dot(w2, hid, preferred_element_type=jnp.float32)          # (C, 2)
    ca = jax.nn.sigmoid(jnp.sum(att, axis=1, keepdims=True))            # (C, 1)

    # Elementwise scaling stays in the input dtype (bf16-friendly on v6e/v7x).
    xc = x * ca.astype(x.dtype)                     # (C, HW)

    # ---------------- spatial attention ----------------
    xcf = xc.astype(jnp.float32)
    avg_c = jnp.mean(xcf, axis=0, keepdims=True)    # (1, HW)
    max_c = jnp.max(xcf, axis=0, keepdims=True)     # (1, HW)

    # 7x7 zero-padded conv over the 2-channel [avg, max] map as two MXU
    # matmuls against the precomputed dense conv matrices: no scalar loads,
    # no cross-lane shifts, no pad/concat, f32 accumulation.
    conv = (jnp.dot(avg_c, cm_ref[0], preferred_element_type=jnp.float32) +
            jnp.dot(max_c, cm_ref[1], preferred_element_type=jnp.float32))  # (1, HW)
    satt = jax.nn.sigmoid(conv)                     # (1, HW)

    o_ref[...] = (xc * satt.astype(x.dtype)).astype(o_ref.dtype)


def _build_conv_matrix(ws, H, W):
    """Expand (2, 7, 7) conv weights into dense (2, H*W, H*W) matrices M with
    M[c, q, p] = ws[c, ki, kj] whenever pixel q is the (ki, kj) neighbor of
    pixel p under 'same' zero padding, so that
        conv_flat = avg_flat @ M[0] + max_flat @ M[1]
    exactly reproduces Conv2d(2, 1, 7, padding=3, bias=False)."""
    pad = KSIZE // 2
    HW = H * W
    p = jnp.arange(HW)
    ph, pw = p // W, p % W
    ki = jnp.arange(KSIZE)
    kj = jnp.arange(KSIZE)
    nh = ph[:, None, None] + ki[None, :, None] - pad             # (HW, 7, 7)
    nw = pw[:, None, None] + kj[None, None, :] - pad             # (HW, 7, 7)
    valid = (nh >= 0) & (nh < H) & (nw >= 0) & (nw < W)          # (HW, 7, 7)
    q = jnp.clip(nh, 0, H - 1) * W + jnp.clip(nw, 0, W - 1)      # (HW, 7, 7)
    vals = jnp.where(valid[None], ws.astype(jnp.float32)[:, None, :, :], 0.0)
    c_idx = jnp.arange(2)[:, None, None, None]
    q_b = jnp.broadcast_to(q[None], (2, HW, KSIZE, KSIZE))
    p_b = jnp.broadcast_to(p[:, None, None][None], (2, HW, KSIZE, KSIZE))
    m = jnp.zeros((2, HW, HW), jnp.float32)
    return m.at[c_idx, q_b, p_b].add(vals)


def cbam_apply(x, w1, w2, ws):
    """Apply one SCCBAMMModule (CBAM block) to a (B, C, H, W) feature map."""
    B, C, H, W = x.shape
    HW = H * W
    Cr = w1.shape[0]

    x_flat = x.reshape(B, C, HW)                 # lane-dense layout for the kernel
    conv_mat = _build_conv_matrix(ws, H, W)      # (2, HW, HW), amortized over batch

    # Rough VMEM budget: double-buffered in/out feature blocks + resident
    # weights; clamp to stay inside v7x's 64 MiB per-TC VMEM.
    itemsize = x.dtype.itemsize
    need = (4 * C * HW * itemsize +
            2 * (conv_mat.size * 4 + (w1.size + w2.size) * 4))
    vmem_limit = int(min(max(2 * need, 16 * 1024 * 1024), 64 * 1024 * 1024))

    out_flat = pl.pallas_call(
        _cbam_kernel,
        out_shape=jax.ShapeDtypeStruct((B, C, HW), x.dtype),
        grid=(B,),
        in_specs=[
            pl.BlockSpec((None, C, HW), lambda b: (b, 0, 0)),    # x (batch squeezed)
            pl.BlockSpec((Cr, C), lambda b: (0, 0)),             # W1
            pl.BlockSpec((C, Cr), lambda b: (0, 0)),             # W2
            pl.BlockSpec((2, HW, HW), lambda b: (0, 0, 0)),      # conv matrices
        ],
        out_specs=pl.BlockSpec((None, C, HW), lambda b: (b, 0, 0)),
        compiler_params=pltpu.CompilerParams(
            dimension_semantics=("parallel",),
            vmem_limit_bytes=vmem_limit),
    )(x_flat, w1, w2, conv_mat)
    return out_flat.reshape(B, C, H, W)


def init_sccbam_params(in_channels_list, reduction=REDUCTION, key=None):
    """Deterministic per-level parameters (one CBAM block per FPN level)."""
    if key is None:
        key = jax.random.PRNGKey(0)
    params = []
    for idx, C in enumerate(in_channels_list):
        kk = jax.random.fold_in(key, idx)
        k1, k2, k3 = jax.random.split(kk, 3)
        Cr = max(C // reduction, 1)
        # channel MLP: W1 (Cr, C), W2 (C, Cr); spatial conv: (2, 7, 7); no biases
        w1 = jax.random.normal(k1, (Cr, C), jnp.float32) / jnp.sqrt(float(C))
        w2 = jax.random.normal(k2, (C, Cr), jnp.float32) / jnp.sqrt(float(Cr))
        ws = jax.random.normal(k3, (2, KSIZE, KSIZE), jnp.float32) / jnp.sqrt(
            float(2 * KSIZE * KSIZE))
        params.append((w1, w2, ws))
    return params


def sccbam_module(fpn_features, params):
    """Equivalent of SCCBAM_Module.forward: per-level attention, in order."""
    outs = []
    for feature, (w1, w2, ws) in zip(fpn_features, params):
        outs.append(cbam_apply(feature, w1, w2, ws))
    return outs


if __name__ == "__main__":
    key = jax.random.PRNGKey(0)

    # small FPN-style pyramid: two levels with different channels / resolutions
    in_channels_list = [4, 8]
    spatial_sizes = [16, 8]
    B = 2

    fpn_features = []
    for i, (C, S) in enumerate(zip(in_channels_list, spatial_sizes)):
        fpn_features.append(
            jax.random.normal(jax.random.fold_in(key, 100 + i), (B, C, S, S),
                              jnp.float32))

    params = init_sccbam_params(in_channels_list, reduction=REDUCTION,
                                key=jax.random.fold_in(key, 7))

    outs = sccbam_module(fpn_features, params)
    for o in outs:
        jax.block_until_ready(o)
    assert all(o.shape == f.shape for o, f in zip(outs, fpn_features))
    assert all(bool(jnp.all(jnp.isfinite(o))) for o in outs)
    print("KERNEL_OK")
</pallas_src>

<mosaic_0001>
module attributes {stable_mosaic.version = 11 : i64} {
  func.func @_cbam_kernel(%arg0: i32, %arg1: memref<1x4x256xf32, #tpu.memory_space<vmem>>, %arg2: memref<2x4xf32, #tpu.memory_space<vmem>>, %arg3: memref<4x2xf32, #tpu.memory_space<vmem>>, %arg4: memref<2x256x256xf32, #tpu.memory_space<vmem>>, %arg5: memref<1x4x256xf32, #tpu.memory_space<vmem>>) attributes {dimension_semantics = [#tpu.dimension_semantics<parallel>], iteration_bounds = array<i64: 2>, scalar_prefetch = 0 : i64, scratch_operands = 0 : i64, tpu.core_type = #tpu.core_type<tc>, window_params = [{transform_indices = @transform_0, window_bounds = array<i64: 1, 4, 256>}, {pipeline_mode = #tpu.pipeline_mode<synchronous>, transform_indices = @transform_1, window_bounds = array<i64: 2, 4>}, {pipeline_mode = #tpu.pipeline_mode<synchronous>, transform_indices = @transform_2, window_bounds = array<i64: 4, 2>}, {pipeline_mode = #tpu.pipeline_mode<synchronous>, transform_indices = @transform_3, window_bounds = array<i64: 2, 256, 256>}, {transform_indices = @transform_4, window_bounds = array<i64: 1, 4, 256>}]} {
    %c0 = arith.constant 0 : index
    %c0_0 = arith.constant 0 : index
    %c0_1 = arith.constant 0 : index
    %0 = vector.load %arg1[%c0, %c0_0, %c0_1] : memref<1x4x256xf32, #tpu.memory_space<vmem>>, vector<1x4x256xf32>
    %1 = vector.shape_cast %0 : vector<1x4x256xf32> to vector<4x256xf32>
    %cst = arith.constant dense<0.000000e+00> : vector<4xf32>
    %2 = vector.multi_reduction <add>, %1, %cst [1] : vector<4x256xf32> to vector<4xf32>
    %3 = vector.shape_cast %2 : vector<4xf32> to vector<4x1xf32>
    %cst_2 = arith.constant 2.560000e+02 : f32
    %4 = vector.broadcast %cst_2 : f32 to vector<4x1xf32>
    %5 = arith.divf %3, %4 : vector<4x1xf32>
    %cst_3 = arith.constant dense<0xFF800000> : vector<4xf32>
    %6 = vector.multi_reduction <maximumf>, %1, %cst_3 [1] : vector<4x256xf32> to vector<4xf32>
    %7 = vector.shape_cast %6 : vector<4xf32> to vector<4x1xf32>
    %8 = tpu.concatenate %5, %7 in 1 : vector<4x1xf32>, vector<4x1xf32> -> vector<4x2xf32>
    %c0_4 = arith.constant 0 : index
    %c0_5 = arith.constant 0 : index
    %9 = vector.load %arg2[%c0_4, %c0_5] : memref<2x4xf32, #tpu.memory_space<vmem>>, vector<2x4xf32>
    %c0_6 = arith.constant 0 : index
    %c0_7 = arith.constant 0 : index
    %10 = vector.load %arg3[%c0_6, %c0_7] : memref<4x2xf32, #tpu.memory_space<vmem>>, vector<4x2xf32>
    %cst_8 = arith.constant dense<0.000000e+00> : vector<2x2xf32>
    %11 = tpu.matmul %9, %8, %cst_8 {dimension_numbers = #tpu.dot_dimension_numbers<[1], [0], [0], [1], [0, 0, 1, 1], [], []>} : vector<2x4xf32>, vector<4x2xf32>, vector<2x2xf32> -> vector<2x2xf32>
    %cst_9 = arith.constant 0.000000e+00 : f32
    %12 = vector.broadcast %cst_9 : f32 to vector<2x2xf32>
    %13 = arith.maximumf %11, %12 : vector<2x2xf32>
    %cst_10 = arith.constant dense<0.000000e+00> : vector<4x2xf32>
    %14 = tpu.matmul %10, %13, %cst_10 {dimension_numbers = #tpu.dot_dimension_numbers<[1], [0], [0], [1], [0, 0, 1, 1], [], []>} : vector<4x2xf32>, vector<2x2xf32>, vector<4x2xf32> -> vector<4x2xf32>
    %cst_11 = arith.constant dense<0.000000e+00> : vector<4xf32>
    %15 = vector.multi_reduction <add>, %14, %cst_11 [1] : vector<4x2xf32> to vector<4xf32>
    %16 = vector.shape_cast %15 : vector<4xf32> to vector<4x1xf32>
    %17 = arith.negf %16 : vector<4x1xf32>
    %18 = math.exp %17 : vector<4x1xf32>
    %cst_12 = arith.constant 1.000000e+00 : f32
    %19 = vector.broadcast %cst_12 : f32 to vector<4x1xf32>
    %20 = arith.addf %19, %18 : vector<4x1xf32>
    %21 = arith.divf %19, %20 : vector<4x1xf32>
    %22 = vector.broadcast %21 : vector<4x1xf32> to vector<4x256xf32>
    %23 = arith.mulf %1, %22 : vector<4x256xf32>
    %cst_13 = arith.constant dense<0.000000e+00> : vector<256xf32>
    %24 = vector.multi_reduction <add>, %23, %cst_13 [0] : vector<4x256xf32> to vector<256xf32>
    %25 = vector.shape_cast %24 : vector<256xf32> to vector<1x256xf32>
    %cst_14 = arith.constant 4.000000e+00 : f32
    %26 = vector.broadcast %cst_14 : f32 to vector<1x256xf32>
    %27 = arith.divf %25, %26 : vector<1x256xf32>
    %cst_15 = arith.constant dense<0xFF800000> : vector<256xf32>
    %28 = vector.multi_reduction <maximumf>, %23, %cst_15 [0] : vector<4x256xf32> to vector<256xf32>
    %29 = vector.shape_cast %28 : vector<256xf32> to vector<1x256xf32>
    %c0_16 = arith.constant 0 : index
    %c0_17 = arith.constant 0 : index
    %c0_18 = arith.constant 0 : index
    %30 = vector.load %arg4[%c0_16, %c0_17, %c0_18] : memref<2x256x256xf32, #tpu.memory_space<vmem>>, vector<1x256x256xf32>
    %31 = vector.shape_cast %30 : vector<1x256x256xf32> to vector<256x256xf32>
    %cst_19 = arith.constant dense<0.000000e+00> : vector<1x256xf32>
    %32 = tpu.matmul %27, %31, %cst_19 {dimension_numbers = #tpu.dot_dimension_numbers<[1], [0], [0], [1], [0, 0, 1, 1], [], []>} : vector<1x256xf32>, vector<256x256xf32>, vector<1x256xf32> -> vector<1x256xf32>
    %c1 = arith.constant 1 : index
    %c0_20 = arith.constant 0 : index
    %c0_21 = arith.constant 0 : index
    %33 = vector.load %arg4[%c1, %c0_20, %c0_21] : memref<2x256x256xf32, #tpu.memory_space<vmem>>, vector<1x256x256xf32>
    %34 = vector.shape_cast %33 : vector<1x256x256xf32> to vector<256x256xf32>
    %cst_22 = arith.constant dense<0.000000e+00> : vector<1x256xf32>
    %35 = tpu.matmul %29, %34, %cst_22 {dimension_numbers = #tpu.dot_dimension_numbers<[1], [0], [0], [1], [0, 0, 1, 1], [], []>} : vector<1x256xf32>, vector<256x256xf32>, vector<1x256xf32> -> vector<1x256xf32>
    %36 = arith.addf %32, %35 : vector<1x256xf32>
    %37 = arith.negf %36 : vector<1x256xf32>
    %38 = math.exp %37 : vector<1x256xf32>
    %cst_23 = arith.constant 1.000000e+00 : f32
    %39 = vector.broadcast %cst_23 : f32 to vector<1x256xf32>
    %40 = arith.addf %39, %38 : vector<1x256xf32>
    %41 = arith.divf %39, %40 : vector<1x256xf32>
    %42 = vector.broadcast %41 : vector<1x256xf32> to vector<4x256xf32>
    %43 = arith.mulf %23, %42 : vector<4x256xf32>
    %c0_24 = arith.constant 0 : index
    %c0_25 = arith.constant 0 : index
    %c0_26 = arith.constant 0 : index
    %44 = vector.load %arg5[%c0_24, %c0_25, %c0_26] : memref<1x4x256xf32, #tpu.memory_space<vmem>>, vector<1x4x256xf32>
    %45 = vector.shape_cast %44 : vector<1x4x256xf32> to vector<4x256xf32>
    %46 = vector.shape_cast %43 : vector<4x256xf32> to vector<1x4x256xf32>
    tpu.vector_store %arg5[%c0_24, %c0_25, %c0_26], %46 {strides = array<i32>} : memref<1x4x256xf32, #tpu.memory_space<vmem>>, vector<1x4x256xf32>,
    return
  }
  func.func @transform_0(%arg0: i32) -> (i32, i32, i32) {
    %c0_i32 = arith.constant 0 : i32
    %c0_i32_0 = arith.constant 0 : i32
    %c0_i32_1 = arith.constant 0 : i32
    return %arg0, %c0_i32, %c0_i32_0 : i32, i32, i32
  }
  func.func @transform_1(%arg0: i32) -> (i32, i32) {
    %c0_i32 = arith.constant 0 : i32
    %c0_i32_0 = arith.constant 0 : i32
    %c0_i32_1 = arith.constant 0 : i32
    return %c0_i32, %c0_i32_0 : i32, i32
  }
  func.func @transform_2(%arg0: i32) -> (i32, i32) {
    %c0_i32 = arith.constant 0 : i32
    %c0_i32_0 = arith.constant 0 : i32
    %c0_i32_1 = arith.constant 0 : i32
    return %c0_i32, %c0_i32_0 : i32, i32
  }
  func.func @transform_3(%arg0: i32) -> (i32, i32, i32) {
    %c0_i32 = arith.constant 0 : i32
    %c0_i32_0 = arith.constant 0 : i32
    %c0_i32_1 = arith.constant 0 : i32
    %c0_i32_2 = arith.constant 0 : i32
    return %c0_i32, %c0_i32_0, %c0_i32_1 : i32, i32, i32
  }
  func.func @transform_4(%arg0: i32) -> (i32, i32, i32) {
    %c0_i32 = arith.constant 0 : i32
    %c0_i32_0 = arith.constant 0 : i32
    %c0_i32_1 = arith.constant 0 : i32
    return %arg0, %c0_i32, %c0_i32_0 : i32, i32, i32
  }
}

</mosaic_0001>

<bundles_post_ra>
// kernel: tpu_custom_call.1
= control target key start
LH: loop header
LB: loop body
LE: loop exit
PB: predicated region body
PF: predicated region fallthrough
CT: control target
= control target key end

     0   :  { %9 = vsyncpa [#allocation3], 0  ;;  %s1481_s0 = inlined_call_operand.hbm [shape: f32[2,4,256], index: 0, kind: input, shape index: {}]   ;;  %s1482_s1 = inlined_call_operand.vmem [shape: f32[2,4], index: 1, kind: input, shape index: {}]   ;;  %s1483_s2 = inlined_call_operand.vmem [shape: f32[4,2], index: 2, kind: input, shape index: {}]   ;;  %s1484_s3 = inlined_call_operand.hbm [shape: f32[2,256,256], index: 3, kind: input, shape index: {}]   ;;  %s1485_s4 = inlined_call_operand.hbm [shape: f32[2,4,256], index: 4, kind: output, shape index: {}]  }
   0x1   :  { %11 = vsyncpa [#allocation3 + $0x1], 0 }
   0x2   :  { %12 = vsyncpa [#allocation6], 0 }
   0x3   :  { %13 = vsyncpa [#allocation4], 0 }
   0x4   :  { %15 = vsyncpa [#allocation4 + $0x1], 0  ;;  %s1259_s15 = smov 0   ;;  %s1261_s16 = smov 0  }
   0x5   :  { %s1263_s17 = smov 0   ;;  %s1265_s18 = smov 0  }
   0x6 LB: > { %s1280_s19 = sadd.s32 4294967295, %s1224_s18   ;;  %s852_s20 = sadd.s32 4294967294, %s1224_s18   ;;  %s1224_s18 = sphi %s1265_s18, %s1505_s18   ;;  %s1220_s17 = sphi %s1263_s17, %s1504_s17   ;;  %s1216_s16 = sphi %s1261_s16, %s1503_s16   ;;  %s1212_s15 = sphi %s1259_s15, %s1502_s15  }
   0x7   : > { %p41_p0 = scmp.ne.s32.totalorder %s1216_s16, %s1212_s15  ;;  %p1486_p1 = scmp.eq.s32.totalorder %s1280_s19, 0 }
   0x8   : > { %p134_p3 = scmp.eq.s32.totalorder %s852_s20, 1  ;;  %p853_p5 = scmp.ge.s32.totalorder %s1224_s18, 1 }
   0x9   : > { %p1289_p4 = por %p1486_p1, %p41_p0  ;;  %p141_p7 = scmp.lt.s32.totalorder %s1224_s18, 3 }
   0xa   : > { %p1294_p6 = por %p134_p3, %p41_p0  ;;  %s1226_s24 = smov [#allocation5]  }
   0xb   : > { %s1489_s21 = scalar_select %p1289_p4, 1, 0 }
   0xc   : > { %s1490_s22 = scalar_select %p1294_p6, 1, 0 }
   0xd   : > { %p1299_p8 = pnand %p853_p5, %p141_p7  ;;  %s159_s25 = sshll.u32 %s1226_s24, 4  ;;  %s1303_s25 = int_to_ptr.vmem [resolvable:$true] %s159_s25 }
   0xe   : > { %s1315_s27 = sadd.s32 1, %s1224_s18   ;;  %s28_s28 = sadd.s32 1, %s1220_s17 }
   0xf   : > { %s1491_s23 = scalar_select %p1299_p8, 1, 0 }
  0x10   : > { %p1029_p9 = pneg %p1299_p8  ;;  %s25_s29 = ssub.s32 %s1224_s18, %s1315_s27 }
  0x11   : > { %s1096_s6 = scalar_lea.hbm %s1484_s3, 16384 }
  0x12   : > { %p1310_p11 = pnand %p1029_p9, %p1486_p1  ;;  %p1097_p12 = scmp.ne.s32.totalorder %s1484_s3, %s1096_s6 }
  0x13   : > { %p1103_p5 = scmp.lt.u32.totalorder %s1096_s6, %s1484_s3 }
  0x14   : > { %p1098_p13 = pneg %p1310_p11 }
  0x16   : > { %p1099_p0 = pnand %p1098_p13, %p1097_p12 }
  0x18   : > { %p1100_p3 = pneg %p1099_p0 }
  0x1a   : > { %p1105_p7 = pnand %p1103_p5, %p1100_p3 }
  0x1c   : > { %1108 = shalt.err (!%p1105_p7)
}
  0x1d   : > { %s1109_s11 = scalar_lea.vmem %s1303_s25, 16384  ;;  %p1117_p2 = scmp.lt.s32.totalorder %s1303_s25, %s1303_s25 }
  0x1e   : > { %p1110_p9 = scmp.ne.s32.totalorder %s1303_s25, %s1109_s11  ;;  %p1118_p6 = scmp.lt.s32.totalorder %s1109_s11, %s1109_s11 }
  0x20   : > { %p1112_p10 = pnand %p1110_p9, %p1098_p13  ;;  %p1119_p4 = por %p1118_p6, %p1117_p2 }
  0x22   : > { %p1113_p1 = pneg %p1112_p10 }
  0x24   : > { %p1120_p8 = pnand %p1119_p4, %p1113_p1 }
  0x26   : > { %1123 = shalt.err (!%p1120_p8)
}
  0x27   : > { %s1227_s12 = smov 256   ;;  %s1228_s13 = smov 16  }
  0x28   : > { %1032 = dma.hbm_to_vmem [thread:$0]  (!%p1310_p11), %s1484_s3, 16384, %s1303_s25, [#allocation6], %s1227_s12, %s1227_s12, %s1228_s13  }
  0x29   : > { %p26_p2 = scmp.eq.s32.totalorder %s25_s29, 0  ;;  %p35_p1 = scmp.ne.s32.totalorder %s1220_s17, %s1216_s16 }
  0x2a   : > { %p36_p4 = scmp.eq.s32.totalorder %s1224_s18, 0  ;;  %p1042_p6 = scmp.lt.s32.totalorder %s1224_s18, 2 }
  0x2b   : > { %s1346_s24 = scalar_select %p26_p2, %s1220_s17, %s28_s28  }
  0x2c   : > { %p37_p8 = por %p36_p4, %p35_p1  ;;  %p1493_p10 = scmp.eq.s32.totalorder %s1280_s19, 1 }
  0x2d   : > { %s173_s5 = sand.u32 1, %s1220_s17   ;;  %s875_s6 = sshll.u32 %s1224_s18, 7 }
  0x2e   : > { %p1350_p12 = por %p1493_p10, %p35_p1  ;;  %s856_s7 = sshll.u32 %s173_s5, 3 }
  0x2f   : > { %s1359_s9 = scalar_lea.hbm %s1481_s0, %s875_s6  ;;  %s177_s25 = scalar_lea.vmem [#allocation2], %s856_s7 }
  0x30   : > { %s185_s28 = sshll.u32 %s177_s25, 4  ;;  %p1361_p11 = pnand %p1042_p6, %p37_p8  ;;  %s1365_s28 = int_to_ptr.vmem [resolvable:$true] %s185_s28 }
  0x31   : > { %s174_s10 = scalar_lea.sflag [#allocation3], %s173_s5  ;;  %s1124_s11 = scalar_lea.hbm %s1359_s9, 128 }
  0x32   : > { %p1125_p13 = scmp.ne.s32.totalorder %s1359_s9, %s1124_s11  ;;  %p1126_p0 = pneg %p1361_p11 }
  0x33   : > { %s1129_s14 = scalar_lea.hbm %s1481_s0, 256  ;;  %p1130_p7 = scmp.lt.u32.totalorder %s1359_s9, %s1481_s0 }
  0x34   : > { %p1127_p3 = pnand %p1126_p0, %p1125_p13  ;;  %p1131_p9 = scmp.lt.u32.totalorder %s1129_s14, %s1124_s11 }
  0x35   : > { %p1133_p1 = scmp.lt.u32.totalorder %s1124_s11, %s1359_s9 }
  0x36   : > { %p1128_p5 = pneg %p1127_p3  ;;  %p1132_p2 = por %p1131_p9, %p1130_p7 }
  0x38   : > { %p1134_p4 = por %p1133_p1, %p1132_p2 }
  0x3a   : > { %p1135_p6 = pnand %p1134_p4, %p1128_p5 }
  0x3c   : > { %1138 = shalt.err (!%p1135_p6)
}
  0x3d   : > { %s1139_s5 = scalar_lea.vmem %s1365_s28, 128  ;;  %s1229_s7 = smov [#allocation2]  }
  0x3e   : > { %p1140_p8 = scmp.ne.s32.totalorder %s1365_s28, %s1139_s5  ;;  %s1144_s26 = sshll.u32 %s1229_s7, 4  ;;  %s1145_s26 = int_to_ptr.vmem [resolvable:$false] %s1144_s26 }
  0x3f   : > { %s1146_s8 = scalar_lea.vmem %s1145_s26, 256  ;;  %p1147_p3 = scmp.lt.s32.totalorder %s1365_s28, %s1145_s26 }
  0x40   : > { %p1142_p10 = pnand %p1140_p8, %p1126_p0  ;;  %p1148_p7 = scmp.lt.s32.totalorder %s1146_s8, %s1139_s5 }
  0x42   : > { %p1143_p13 = pneg %p1142_p10  ;;  %p1149_p9 = por %p1148_p7, %p1147_p3 }
  0x44   : > { %p1150_p2 = pnand %p1149_p9, %p1143_p13 }
  0x46   : > { %1153 = shalt.err (!%p1150_p2)
}
  0x47   : > { %1036 = dma.hbm_to_vmem [thread:$0]  (!%p1361_p11), %s1359_s9, 128, %s1365_s28, %s174_s10  }
  0x48   : > { %p1496_p5 = scmp.ne.s32.totalorder %s1491_s23, 0 }
  0x49   : > { %s1395_s25 = sand.u32 (!%p1496_p5), 1, %s1216_s16   ;;  %p1497_p0 = scmp.ne.s32.totalorder (!%p1496_p5), %s1489_s21, 0 }
  0x4a   : > { %194 = sbr.rel (%p1496_p5) target bundleno = 1118 (0x45e), region = 36  ;;  %s860_s11 = sshll.u32 (!%p1496_p5), %s1395_s25, 3 }
  0x4b   : > { %s197_s12 = scalar_lea.sflag (!%p1496_p5), [#allocation3], %s1395_s25  ;;  %s200_s13 = scalar_lea.vmem (!%p1496_p5), [#allocation2], %s860_s11 }
  0x51   : > { %1199 = dma.done.wait (%p1497_p0), %s197_s12, 128  }
  0x52   : > { %1201 = vsyncadd (%p1497_p0), %s197_s12, 4294967168  ;;  %p1498_p11 = scmp.eq.s32.totalorder %s1280_s19, 0 }
  0x54   : > { %1203 = dma.done.wait (%p1498_p11), [#allocation6], 16384   ;;  %p1499_p1 = pmov %p1498_p11 }
  0x55   : > { %vm233_vm0 = vcmask 1043456   ;;  %v1409_v0 = vld [vmem:[%s200_s13] sm:$0xff]  ;;  %v1230_v8 = vmov 0.0   ;;  %vm1231_vm1 = vmmov 0   ;;  %vm246_vm2 = vcmask 7168   ;;  %v526_v18 = vld [vmem:[#allocation5 + $0x208] sm:$0xff] }
  0x56   : > { %1205 = vsyncadd (%p1499_p1), [#allocation6], 4294950912  ;;  %v231_v1 = vcombine.high %v1409_v0, %v1409_v0  ;;  %v234_v2 = vsel %vm233_vm0, %v1409_v0, 0.0  ;;  %v241_v4 = vsel %vm233_vm0, %v1409_v0, -inf  ;;  %881 = vmatprep.subr.mxu0 %v1230_v8  ;;  %886 = vmatprep.subr.mxu1 %v1230_v8  ;;  %v248_v12 = vld [vmem:[%s1482_s1] sm:$0x3] }
  0x57   : > { %883 = vmatprep.mubr.msk.f32.mxu0 %vm1231_vm1, %v1230_v8  ;;  %888 = vmatprep.mubr.msk.f32.mxu1 %vm1231_vm1, %v1230_v8  ;;  %vm250_vm3 = vcmask 31744   ;;  %vm332_vm4 = vcmask 1041408   ;;  %v249_v17 = vld [vmem:[%s1483_s2] sm:$0xf]  ;;  %vm328_vm5 = vcmask 15360   ;;  %v528_v19 = vld [vmem:[#allocation5 + $0x218] sm:$0xff] }
  0x58   : > { %v235_v3 = vsel %vm233_vm0, %v231_v1, 0.0  ;;  %v242_v5 = vsel %vm233_vm0, %v231_v1, -inf  ;;  %v525_v20 = vld [vmem:[#allocation5 + $0x200] sm:$0xff]  ;;  %v891_v21 = vpack.c.bf16 %v528_v19, %v526_v18  ;;  %v527_v22 = vld [vmem:[#allocation5 + $0x210] sm:$0xff]  ;;  %v461_v23 = vld [vmem:[#allocation5 + $0x8] sm:$0xff]  ;;  %vm406_vm6 = vcmask 11264  }
  0x59   : > { %v236_v6 = vadd.f32 %v235_v3, %v234_v2  ;;  %v243_v7 = vmax.f32 %v241_v4, %v242_v5  ;;  %v463_v24 = vld [vmem:[#allocation5 + $0x18] sm:$0xff]  ;;  %v893_v25 = vpack.c.bf16 %v527_v22, %v525_v20  ;;  %v460_v27 = vld [vmem:[#allocation5] sm:$0xff]  ;;  %v462_v28 = vld [vmem:[#allocation5 + $0x10] sm:$0xff]  ;;  %s876_s29 = sshll.u32 %s1280_s19, 7  ;;  %s228_s10 = scalar_lea.vmem [#allocation7], %s860_s11 }
  0x5a   : > { %v955_v26 = vpack.c.bf16 %v463_v24, %v461_v23  ;;  %v530_v29 = vld [vmem:[#allocation5 + $0x228] sm:$0xff]  ;;  %v957_v30 = vpack.c.bf16 %v462_v28, %v460_v27  ;;  %v532_v31 = vld [vmem:[#allocation5 + $0x238] sm:$0xff]  ;;  %v529_v32 = vld [vmem:[#allocation5 + $0x220] sm:$0xff]  ;;  %s772_s14 = sshll.u32 %s228_s10, 4  ;;  %s1437_s5 = scalar_lea.hbm %s1485_s4, %s876_s29  ;;  %s1439_s14 = int_to_ptr.vmem [resolvable:$true] %s772_s14 }
  0x5b   : > { %237 = vadd.xlane.f32.xlu0 %v236_v6  ;;  %v531_v33 = vld [vmem:[#allocation5 + $0x230] sm:$0xff]  ;;  %v895_v34 = vpack.c.bf16 %v532_v31, %v530_v29  ;;  %v465_v36 = vld [vmem:[#allocation5 + $0x28] sm:$0xff]  ;;  %v467_v37 = vld [vmem:[#allocation5 + $0x38] sm:$0xff]  ;;  %s758_s7 = scalar_lea.sflag [#allocation4], %s1395_s25  ;;  %s1154_s26 = scalar_lea.vmem %s1439_s14, 128 }
  0x5c   : > { %v897_v35 = vpack.c.bf16 %v531_v33, %v529_v32  ;;  %v464_v38 = vld [vmem:[#allocation5 + $0x20] sm:$0xff]  ;;  %v959_v39 = vpack.c.bf16 %v467_v37, %v465_v36  ;;  %v466_v40 = vld [vmem:[#allocation5 + $0x30] sm:$0xff]  ;;  %v534_v41 = vld [vmem:[#allocation5 + $0x248] sm:$0xff]  ;;  %p1155_p4 = scmp.ne.s32.totalorder %s1439_s14, %s1154_s26  ;;  %s1233_s19 = smov [#allocation7]  }
  0x5d   : > { %v536_v42 = vld [vmem:[#allocation5 + $0x258] sm:$0xff]  ;;  %v961_v43 = vpack.c.bf16 %v466_v40, %v464_v38  ;;  %v533_v45 = vld [vmem:[#allocation5 + $0x240] sm:$0xff]  ;;  %v535_v46 = vld [vmem:[#allocation5 + $0x250] sm:$0xff]  ;;  %s1158_s8 = sshll.u32 %s1233_s19, 4  ;;  %s1159_s8 = int_to_ptr.vmem [resolvable:$false] %s1158_s8 }
  0x5e   : > { %v899_v44 = vpack.c.bf16 %v536_v42, %v534_v41  ;;  %v469_v47 = vld [vmem:[#allocation5 + $0x48] sm:$0xff]  ;;  %v471_v48 = vld [vmem:[#allocation5 + $0x58] sm:$0xff]  ;;  %v468_v49 = vld [vmem:[#allocation5 + $0x40] sm:$0xff]  ;;  %v901_v51 = vpack.c.bf16 %v535_v46, %v533_v45  ;;  %p1156_p6 = pnand %p1155_p4, %p1350_p12  ;;  %s1160_s11 = scalar_lea.vmem %s1159_s8, 256 }
  0x5f   : > { %244 = vmax.xlane.f32.xlu0 %v243_v7  ;;  %v470_v50 = vld [vmem:[#allocation5 + $0x50] sm:$0xff]  ;;  %v963_v52 = vpack.c.bf16 %v471_v48, %v469_v47  ;;  %v538_v53 = vld [vmem:[#allocation5 + $0x268] sm:$0xff]  ;;  %v540_v54 = vld [vmem:[#allocation5 + $0x278] sm:$0xff]  ;;  %p1161_p10 = scmp.lt.s32.totalorder %s1439_s14, %s1159_s8  ;;  %p1162_p13 = scmp.lt.s32.totalorder %s1160_s11, %s1154_s26 }
  0x60   : > { %v537_v55 = vld [vmem:[#allocation5 + $0x260] sm:$0xff]  ;;  %v965_v56 = vpack.c.bf16 %v470_v50, %v468_v49  ;;  %v903_v57 = vpack.c.bf16 %v540_v54, %v538_v53  ;;  %v539_v58 = vld [vmem:[#allocation5 + $0x270] sm:$0xff]  ;;  %v473_v59 = vld [vmem:[#allocation5 + $0x68] sm:$0xff]  ;;  %p1157_p8 = pneg %p1156_p6 }
  0x61   : > { %v475_v60 = vld [vmem:[#allocation5 + $0x78] sm:$0xff]  ;;  %v472_v62 = vld [vmem:[#allocation5 + $0x60] sm:$0xff]  ;;  %v474_v63 = vld [vmem:[#allocation5 + $0x70] sm:$0xff]  ;;  %v905_v3 = vpack.c.bf16 %v539_v58, %v537_v55  ;;  %p1163_p3 = por %p1162_p13, %p1161_p10 }
  0x62   : > { %v967_v61 = vpack.c.bf16 %v475_v60, %v473_v59  ;;  %v542_v1 = vld [vmem:[#allocation5 + $0x288] sm:$0xff]  ;;  %v544_v2 = vld [vmem:[#allocation5 + $0x298] sm:$0xff]  ;;  %v969_v4 = vpack.c.bf16 %v474_v63, %v472_v62  ;;  %v541_v6 = vld [vmem:[#allocation5 + $0x280] sm:$0xff] }
  0x63   : > { %v907_v5 = vpack.c.bf16 %v544_v2, %v542_v1  ;;  %v543_v7 = vld [vmem:[#allocation5 + $0x290] sm:$0xff]  ;;  %v546_v18 = vld [vmem:[#allocation5 + $0x2a8] sm:$0xff]  ;;  %v548_v19 = vld [vmem:[#allocation5 + $0x2b8] sm:$0xff]  ;;  %p1164_p7 = pnand %p1163_p3, %p1157_p8 }
  0x64   : > { %v909_v8 = vpack.c.bf16 %v543_v7, %v541_v6  ;;  %v911_v20 = vpack.c.bf16 %v548_v19, %v546_v18  ;;  %v547_v22 = vld [vmem:[#allocation5 + $0x2b0] sm:$0xff]  ;;  %v481_v24 = vld [vmem:[#allocation5 + $0xa8] sm:$0xff]  ;;  %v480_v27 = vld [vmem:[#allocation5 + $0xa0] sm:$0xff] }
  0x65   : > { %v482_v28 = vld [vmem:[#allocation5 + $0xb0] sm:$0xff]  ;;  %v552_v31 = vld [vmem:[#allocation5 + $0x2d8] sm:$0xff]  ;;  %v549_v33 = vld [vmem:[#allocation5 + $0x2c0] sm:$0xff] }
  0x66   : > { %v977_v29 = vpack.c.bf16 %v482_v28, %v480_v27  ;;  %v485_v36 = vld [vmem:[#allocation5 + $0xc8] sm:$0xff]  ;;  %v487_v37 = vld [vmem:[#allocation5 + $0xd8] sm:$0xff]  ;;  %v486_v40 = vld [vmem:[#allocation5 + $0xd0] sm:$0xff] }
  0x67   : > { %v979_v38 = vpack.c.bf16 %v487_v37, %v485_v36  ;;  %v554_v42 = vld [vmem:[#allocation5 + $0x2e8] sm:$0xff]  ;;  %v553_v45 = vld [vmem:[#allocation5 + $0x2e0] sm:$0xff]  ;;  %v555_v46 = vld [vmem:[#allocation5 + $0x2f0] sm:$0xff] }
  0x68   : > { %v921_v47 = vpack.c.bf16 %v555_v46, %v553_v45  ;;  %v489_v48 = vld [vmem:[#allocation5 + $0xe8] sm:$0xff]  ;;  %v491_v49 = vld [vmem:[#allocation5 + $0xf8] sm:$0xff]  ;;  %v559_v58 = vld [vmem:[#allocation5 + $0x310] sm:$0xff] }
  0x69   : > { %v983_v50 = vpack.c.bf16 %v491_v49, %v489_v48  ;;  %v558_v54 = vld [vmem:[#allocation5 + $0x308] sm:$0xff]  ;;  %v560_v55 = vld [vmem:[#allocation5 + $0x318] sm:$0xff]  ;;  %v492_v63 = vld [vmem:[#allocation5 + $0x100] sm:$0xff] }
  0x6a   : > { %v493_v60 = vld [vmem:[#allocation5 + $0x108] sm:$0xff]  ;;  %v494_v1 = vld [vmem:[#allocation5 + $0x110] sm:$0xff]  ;;  %v561_v6 = vld [vmem:[#allocation5 + $0x320] sm:$0xff] }
  0x6b   : > { %v989_v2 = vpack.c.bf16 %v494_v1, %v492_v63  ;;  %v563_v7 = vld [vmem:[#allocation5 + $0x330] sm:$0xff]  ;;  %v565_v18 = vld [vmem:[#allocation5 + $0x340] sm:$0xff]  ;;  %v570_v27 = vld [vmem:[#allocation5 + $0x368] sm:$0xff] }
  0x6c   : > { %v567_v19 = vld [vmem:[#allocation5 + $0x350] sm:$0xff]  ;;  %v572_v28 = vld [vmem:[#allocation5 + $0x378] sm:$0xff]  ;;  %v504_v36 = vld [vmem:[#allocation5 + $0x160] sm:$0xff] }
  0x6d   : > { %v506_v37 = vld [vmem:[#allocation5 + $0x170] sm:$0xff]  ;;  %v511_v46 = vld [vmem:[#allocation5 + $0x198] sm:$0xff] }
  0x6e   : > { %v510_v48 = vld [vmem:[#allocation5 + $0x190] sm:$0xff]  ;;  %v584_v1 = vld [vmem:[#allocation5 + $0x3d8] sm:$0xff] }
  0xe8   : > { %v238_v9 = vpop.xlane.xlu0 %237 }
  0xe9   : > { %v240_v10 = vmul.f32 0.00390625, %v238_v9 }
  0xec   : > { %v245_v11 = vpop.xlane.xlu0 %244 }
  0xed   : > { %v247_v13 = vsel %vm246_vm2, %v240_v10, %v245_v11 }
  0xee   : > { %882 = vmatpush3.msk.msra.mxu0 %vm233_vm0, %v247_v13  ;;  %v479_v13 = vld [vmem:[#allocation5 + $0x98] sm:$0xff] }
  0xef   : > { %884 = vmatmul.mubr.msk.f32.vlgmr.msra.gmra.mrb[0].mxu0 %vm250_vm3, %v248_v12  ;;  %956 = vmatprep.subr.bf16.mxu0 %v955_v26  ;;  %v477_v12 = vld [vmem:[#allocation5 + $0x88] sm:$0xff] }
  0xf0   : > { %958 = vmatpush1.bf16.msra.mxu0 %v957_v30  ;;  %v550_v30 = vld [vmem:[#allocation5 + $0x2c8] sm:$0xff] }
  0xf1   : > { %960 = vmatprep.subr.bf16.mxu0 %v959_v39  ;;  %v915_v32 = vpack.c.bf16 %v552_v31, %v550_v30  ;;  %v484_v39 = vld [vmem:[#allocation5 + $0xc0] sm:$0xff]  ;;  %v571_v31 = vld [vmem:[#allocation5 + $0x370] sm:$0xff] }
  0xf2   : > { %v981_v41 = vpack.c.bf16 %v486_v40, %v484_v39  ;;  %v569_v30 = vld [vmem:[#allocation5 + $0x360] sm:$0xff]  ;;  %v574_v39 = vld [vmem:[#allocation5 + $0x388] sm:$0xff]  ;;  %v576_v40 = vld [vmem:[#allocation5 + $0x398] sm:$0xff] }
  0xf4   : > { %962 = vmatpush1.bf16.msra.mxu0 %v961_v43  ;;  %v556_v43 = vld [vmem:[#allocation5 + $0x2f8] sm:$0xff] }
  0xf5   : > { %964 = vmatprep.subr.bf16.mxu0 %v963_v52  ;;  %v490_v52 = vld [vmem:[#allocation5 + $0xf0] sm:$0xff] }
  0xf8   : > { %966 = vmatpush1.bf16.msra.mxu0 %v965_v56  ;;  %v923_v56 = vpack.c.bf16 %v560_v55, %v558_v54  ;;  %v579_v55 = vld [vmem:[#allocation5 + $0x3b0] sm:$0xff] }
  0xf9   : > { %968 = vmatprep.subr.bf16.mxu0 %v967_v61  ;;  %v495_v61 = vld [vmem:[#allocation5 + $0x118] sm:$0xff] }
  0xfa   : > { %v987_v62 = vpack.c.bf16 %v495_v61, %v493_v60  ;;  %v512_v60 = vld [vmem:[#allocation5 + $0x1a0] sm:$0xff]  ;;  %v514_v61 = vld [vmem:[#allocation5 + $0x1b0] sm:$0xff] }
  0xfb   : > { %v1009_v63 = vpack.c.bf16 %v514_v61, %v512_v60 }
  0xfc   : > { %970 = vmatpush1.bf16.msra.mxu0 %v969_v4  ;;  %v564_v4 = vld [vmem:[#allocation5 + $0x338] sm:$0xff] }
 0x1c2   : > { %v323_v14 = vpop.f32.mrb[0].mxu0 }
 0x1c3   : > { %v327_v15 = vmax.f32 %v323_v14, 0.0  ;;  %v885_v16 = vpop.f32.mrb[1].mxu0  ;;  %v971_v14 = vpack.c.bf16 %v479_v13, %v477_v12  ;;  %v496_v12 = vld [vmem:[#allocation5 + $0x120] sm:$0xff]  ;;  %v498_v13 = vld [vmem:[#allocation5 + $0x130] sm:$0xff] }
 0x1c4   : > { %v478_v16 = vld [vmem:[#allocation5 + $0x90] sm:$0xff] }
 0x1c5   : > { %887 = vmatpush3.msk.msra.mxu1 %vm332_vm4, %v327_v15  ;;  %v476_v15 = vld [vmem:[#allocation5 + $0x80] sm:$0xff]  ;;  %972 = vmatprep.subr.bf16.mxu0 %v971_v14  ;;  %v993_v14 = vpack.c.bf16 %v498_v13, %v496_v12  ;;  %v588_v12 = vld [vmem:[#allocation5 + $0x3f8] sm:$0xff] }
 0x1c6   : > { %889 = vmatmul.mubr.msk.f32.vlgmr.msra.gmra.mrb[0].mxu1 %vm328_vm5, %v249_v17  ;;  %892 = vmatprep.subr.bf16.mxu1 %v891_v21  ;;  %v973_v17 = vpack.c.bf16 %v478_v16, %v476_v15  ;;  %v545_v21 = vld [vmem:[#allocation5 + $0x2a0] sm:$0xff]  ;;  %v566_v15 = vld [vmem:[#allocation5 + $0x348] sm:$0xff]  ;;  %v568_v16 = vld [vmem:[#allocation5 + $0x358] sm:$0xff] }
 0x1c7   : > { %894 = vmatpush1.bf16.msra.mxu1 %v893_v25  ;;  %v913_v23 = vpack.c.bf16 %v547_v22, %v545_v21  ;;  %v483_v25 = vld [vmem:[#allocation5 + $0xb8] sm:$0xff]  ;;  %v501_v21 = vld [vmem:[#allocation5 + $0x148] sm:$0xff] }
 0x1c8   : > { %896 = vmatprep.subr.bf16.mxu1 %v895_v34  ;;  %974 = vmatpush1.bf16.msra.mxu0 %v973_v17  ;;  %v975_v26 = vpack.c.bf16 %v483_v25, %v481_v24  ;;  %v551_v34 = vld [vmem:[#allocation5 + $0x2d0] sm:$0xff]  ;;  %v931_v17 = vpack.c.bf16 %v568_v16, %v566_v15  ;;  %v503_v22 = vld [vmem:[#allocation5 + $0x158] sm:$0xff]  ;;  %v500_v24 = vld [vmem:[#allocation5 + $0x140] sm:$0xff] }
 0x1c9   : > { %v502_v25 = vld [vmem:[#allocation5 + $0x150] sm:$0xff]  ;;  %v521_v16 = vld [vmem:[#allocation5 + $0x1e8] sm:$0xff] }
 0x1ca   : > { %976 = vmatprep.subr.bf16.mxu0 %v975_v26  ;;  %v997_v26 = vpack.c.bf16 %v502_v25, %v500_v24  ;;  %v587_v15 = vld [vmem:[#allocation5 + $0x3f0] sm:$0xff] }
 0x1cb   : > { %898 = vmatpush1.bf16.msra.mxu1 %v897_v35  ;;  %v917_v35 = vpack.c.bf16 %v551_v34, %v549_v33  ;;  %v505_v33 = vld [vmem:[#allocation5 + $0x168] sm:$0xff]  ;;  %v507_v34 = vld [vmem:[#allocation5 + $0x178] sm:$0xff] }
 0x1cc   : > { %900 = vmatprep.subr.bf16.mxu1 %v899_v44  ;;  %978 = vmatpush1.bf16.msra.mxu0 %v977_v29  ;;  %v919_v44 = vpack.c.bf16 %v556_v43, %v554_v42  ;;  %v935_v29 = vpack.c.bf16 %v572_v28, %v570_v27  ;;  %v573_v42 = vld [vmem:[#allocation5 + $0x380] sm:$0xff]  ;;  %v575_v43 = vld [vmem:[#allocation5 + $0x390] sm:$0xff]  ;;  %v1232_v28 = vmov 839922192  }
 0x1cd   : > { %980 = vmatprep.subr.bf16.mxu0 %v979_v38  ;;  %v1001_v38 = vpack.c.bf16 %v506_v37, %v504_v36  ;;  %v941_v45 = vpack.c.bf16 %v575_v43, %v573_v42 }
 0x1cf   : > { %902 = vmatpush1.bf16.msra.mxu1 %v901_v51  ;;  %v488_v51 = vld [vmem:[#allocation5 + $0xe0] sm:$0xff] }
 0x1d0   : > { %904 = vmatprep.subr.bf16.mxu1 %v903_v57  ;;  %982 = vmatpush1.bf16.msra.mxu0 %v981_v41  ;;  %v985_v53 = vpack.c.bf16 %v490_v52, %v488_v51  ;;  %v557_v57 = vld [vmem:[#allocation5 + $0x300] sm:$0xff]  ;;  %v939_v41 = vpack.c.bf16 %v576_v40, %v574_v39  ;;  %v578_v51 = vld [vmem:[#allocation5 + $0x3a8] sm:$0xff]  ;;  %v580_v52 = vld [vmem:[#allocation5 + $0x3b8] sm:$0xff] }
 0x1d1   : > { %984 = vmatprep.subr.bf16.mxu0 %v983_v50  ;;  %v925_v59 = vpack.c.bf16 %v559_v58, %v557_v57  ;;  %v943_v54 = vpack.c.bf16 %v580_v52, %v578_v51  ;;  %v515_v57 = vld [vmem:[#allocation5 + $0x1b8] sm:$0xff] }
 0x1d3   : > { %906 = vmatpush1.bf16.msra.mxu1 %v905_v3  ;;  %v562_v3 = vld [vmem:[#allocation5 + $0x328] sm:$0xff] }
 0x1d4   : > { %908 = vmatprep.subr.bf16.mxu1 %v907_v5  ;;  %986 = vmatpush1.bf16.msra.mxu0 %v985_v53  ;;  %v927_v5 = vpack.c.bf16 %v564_v4, %v562_v3  ;;  %v577_v53 = vld [vmem:[#allocation5 + $0x3a0] sm:$0xff]  ;;  %v583_v3 = vld [vmem:[#allocation5 + $0x3d0] sm:$0xff] }
 0x1d5   : > { %988 = vmatprep.subr.bf16.mxu0 %v987_v62  ;;  %v945_v58 = vpack.c.bf16 %v579_v55, %v577_v53  ;;  %v582_v62 = vld [vmem:[#allocation5 + $0x3c8] sm:$0xff] }
 0x1d6   : > { %v947_v4 = vpack.c.bf16 %v584_v1, %v582_v62 }
 0x1d7   : > { %910 = vmatpush1.bf16.msra.mxu1 %v909_v8  ;;  %v929_v8 = vpack.c.bf16 %v563_v7, %v561_v6  ;;  %v519_v6 = vld [vmem:[#allocation5 + $0x1d8] sm:$0xff]  ;;  %v516_v7 = vld [vmem:[#allocation5 + $0x1c0] sm:$0xff] }
 0x1d8   : > { %912 = vmatprep.subr.bf16.mxu1 %v911_v20  ;;  %990 = vmatpush1.bf16.msra.mxu0 %v989_v2  ;;  %v933_v20 = vpack.c.bf16 %v567_v19, %v565_v18  ;;  %v581_v2 = vld [vmem:[#allocation5 + $0x3c0] sm:$0xff]  ;;  %v523_v18 = vld [vmem:[#allocation5 + $0x1f8] sm:$0xff] }
 0x1d9   : > { %v1015_v19 = vpack.c.bf16 %v523_v18, %v521_v16 }
 0x1db   : > { %914 = vmatpush1.bf16.msra.mxu1 %v913_v23  ;;  %v995_v23 = vpack.c.bf16 %v503_v22, %v501_v21  ;;  %v520_v21 = vld [vmem:[#allocation5 + $0x1e0] sm:$0xff]  ;;  %v522_v22 = vld [vmem:[#allocation5 + $0x1f0] sm:$0xff] }
 0x1dc   : > { %916 = vmatprep.subr.bf16.mxu1 %v915_v32  ;;  %v937_v32 = vpack.c.bf16 %v571_v31, %v569_v30  ;;  %v420_v30 = vlaneseq }
 0x1df   : > { %918 = vmatpush1.bf16.msra.mxu1 %v917_v35  ;;  %v999_v35 = vpack.c.bf16 %v507_v34, %v505_v33 }
 0x1e0   : > { %920 = vmatprep.subr.bf16.mxu1 %v919_v44  ;;  %v509_v44 = vld [vmem:[#allocation5 + $0x188] sm:$0xff] }
 0x1e1   : > { %v1003_v49 = vpack.c.bf16 %v511_v46, %v509_v44 }
 0x1e3   : > { %922 = vmatpush1.bf16.msra.mxu1 %v921_v47  ;;  %v508_v47 = vld [vmem:[#allocation5 + $0x180] sm:$0xff] }
 0x1e4   : > { %924 = vmatprep.subr.bf16.mxu1 %v923_v56  ;;  %v1005_v50 = vpack.c.bf16 %v510_v48, %v508_v47  ;;  %v513_v56 = vld [vmem:[#allocation5 + $0x1a8] sm:$0xff] }
 0x1e7   : > { %926 = vmatpush1.bf16.msra.mxu1 %v925_v59  ;;  %v1007_v59 = vpack.c.bf16 %v515_v57, %v513_v56 }
 0x1e8   : > { %928 = vmatprep.subr.bf16.mxu1 %v927_v5  ;;  %v517_v5 = vld [vmem:[#allocation5 + $0x1c8] sm:$0xff] }
 0x1eb   : > { %930 = vmatpush1.bf16.msra.mxu1 %v929_v8  ;;  %v949_v8 = vpack.c.bf16 %v583_v3, %v581_v2 }
 0x1ec   : > { %932 = vmatprep.subr.bf16.mxu1 %v931_v17 }
 0x1ef   : > { %934 = vmatpush1.bf16.msra.mxu1 %v933_v20 }
 0x1f0   : > { %936 = vmatprep.subr.bf16.mxu1 %v935_v29  ;;  %v418_v29 = vunpack.c.l.s4 %v1232_v28 }
 0x1f2   : > { %v419_v31 = vunpack.c.0.s8 %v418_v29 }
 0x1f3   : > { %938 = vmatpush1.bf16.msra.mxu1 %v937_v32  ;;  %v421_v32 = vshrl.u32 %v420_v30, 7 }
 0x1f4   : > { %940 = vmatprep.subr.bf16.mxu1 %v939_v41 }
 0x1f5   : > { %v422_v33 = vsub.s32 %v419_v31, %v421_v32  ;;  %v745_v16 = vsub.s32 0, %v421_v32 }
 0x1f7   : > { %942 = vmatpush1.bf16.msra.mxu1 %v941_v45 }
 0x1f8   : > { %944 = vmatprep.subr.bf16.mxu1 %v943_v54 }
 0x1fb   : > { %946 = vmatpush1.bf16.msra.mxu1 %v945_v58 }
 0x1fc   : > { %948 = vmatprep.subr.bf16.mxu1 %v947_v4 }
 0x1ff   : > { %950 = vmatpush1.bf16.msra.mxu1 %v949_v8 }
 0x299   : > { %v402_v9 = vpop.f32.mrb[0].mxu1 }
 0x29a   : > { %v890_v10 = vpop.f32.mrb[1].mxu1  ;;  %v407_v11 = vsel %vm406_vm6, %v402_v9, 0.0  ;;  %v497_v9 = vld [vmem:[#allocation5 + $0x128] sm:$0xff] }
 0x29b   : > { %408 = vadd.xlane.f32.xlu1 %v407_v11  ;;  %v499_v10 = vld [vmem:[#allocation5 + $0x138] sm:$0xff] }
 0x29c   : > { %v991_v11 = vpack.c.bf16 %v499_v10, %v497_v9  ;;  %v1011_v9 = vpack.c.bf16 %v519_v6, %v517_v5  ;;  %v518_v10 = vld [vmem:[#allocation5 + $0x1d0] sm:$0xff] }
 0x29d   : > { %v1013_v17 = vpack.c.bf16 %v518_v10, %v516_v7 }
 0x29e   : > { %992 = vmatprep.subr.bf16.mxu0 %v991_v11  ;;  %v586_v11 = vld [vmem:[#allocation5 + $0x3e8] sm:$0xff] }
 0x29f   : > { %994 = vmatpush1.bf16.msra.mxu0 %v993_v14  ;;  %v951_v13 = vpack.c.bf16 %v588_v12, %v586_v11  ;;  %v585_v14 = vld [vmem:[#allocation5 + $0x3e0] sm:$0xff] }
 0x2a0   : > { %996 = vmatprep.subr.bf16.mxu0 %v995_v23  ;;  %v953_v20 = vpack.c.bf16 %v587_v15, %v585_v14  ;;  %v1017_v23 = vpack.c.bf16 %v522_v22, %v520_v21 }
 0x2a1   : > { %952 = vmatprep.subr.bf16.mxu1 %v951_v13 }
 0x2a2   : > { %954 = vmatpush1.bf16.msra.mxu1 %v953_v20 }
 0x2a3   : > { %998 = vmatpush1.bf16.msra.mxu0 %v997_v26 }
 0x2a4   : > { %1000 = vmatprep.subr.bf16.mxu0 %v999_v35 }
 0x2a7   : > { %1002 = vmatpush1.bf16.msra.mxu0 %v1001_v38 }
 0x2a8   : > { %1004 = vmatprep.subr.bf16.mxu0 %v1003_v49 }
 0x2ab   : > { %1006 = vmatpush1.bf16.msra.mxu0 %v1005_v50 }
 0x2ac   : > { %1008 = vmatprep.subr.bf16.mxu0 %v1007_v59 }
 0x2af   : > { %1010 = vmatpush1.bf16.msra.mxu0 %v1009_v63 }
 0x2b0   : > { %1012 = vmatprep.subr.bf16.mxu0 %v1011_v9 }
 0x2b3   : > { %1014 = vmatpush1.bf16.msra.mxu0 %v1013_v17 }
 0x2b4   : > { %1016 = vmatprep.subr.bf16.mxu0 %v1015_v19 }
 0x2b7   : > { %1018 = vmatpush1.bf16.msra.mxu0 %v1017_v23 }
 0x328   : > { %v409_v24 = vpop.xlane.xlu1 %408 }
 0x329   : > { %v867_v25 = vmul.f32 -1.442695, %v409_v24 }
 0x32b   : > { %1084 = vpow2.f32 %v867_v25 }
 0x335   : > { %v1085_v26 = vpop.eup %1084 }
 0x336   : > { %v413_v27 = vadd.f32 1.0, %v1085_v26 }
 0x338   : > { %1086 = vrcp.f32 %v413_v27 }
 0x342   : > { %v1087_v34 = vpop.eup %1086 }
 0x343   : > { %v423_v35 = vrot.slane %v1087_v34, %v422_v33 }
 0x345   : > { %v425_v36 = vmul.f32 %v423_v35, %v1409_v0 }
 0x347   : > { %v427_v37 = vcombine.high %v425_v36, %v425_v36  ;;  %v446_v38 = vsel %vm233_vm0, %v425_v36, -inf  ;;  %v429_v39 = vsel %vm233_vm0, %v425_v36, 0.0 }
 0x348   : > { %v447_v40 = vrot.slane %v446_v38, 4  ;;  %v430_v41 = vrot.slane %v429_v39, 4 }
 0x349   : > { %v453_v42 = vsel %vm233_vm0, %v427_v37, -inf  ;;  %v436_v43 = vsel %vm233_vm0, %v427_v37, 0.0 }
 0x34a   : > { %v454_v44 = vrot.slane %v453_v42, 4  ;;  %v448_v45 = vmax.f32 %v446_v38, %v447_v40  ;;  %v437_v46 = vrot.slane %v436_v43, 4  ;;  %v431_v47 = vadd.f32 %v430_v41, %v429_v39 }
 0x34c   : > { %v455_v48 = vmax.f32 %v453_v42, %v454_v44  ;;  %v449_v49 = vrot.slane %v448_v45, 2  ;;  %v438_v50 = vadd.f32 %v437_v46, %v436_v43  ;;  %v432_v51 = vrot.slane %v431_v47, 2 }
 0x34e   : > { %v456_v0 = vrot.slane %v455_v48, 2  ;;  %v450_v52 = vmax.f32 %v448_v45, %v449_v49  ;;  %v439_v53 = vrot.slane %v438_v50, 2  ;;  %v433_v54 = vadd.f32 %v432_v51, %v431_v47 }
 0x350   : > { %v457_v55 = vmax.f32 %v455_v48, %v456_v0  ;;  %v440_v56 = vadd.f32 %v439_v53, %v438_v50  ;;  %v434_v57 = vrot.slane %v433_v54, 1  ;;  %v451_v58 = vrot.slane %v450_v52, 1 }
 0x352   : > { %v458_v59 = vrot.slane %v457_v55, 1  ;;  %v441_v60 = vrot.slane %v440_v56, 1  ;;  %v435_v61 = vadd.f32 %v434_v57, %v433_v54  ;;  %v452_v1 = vmax.f32 %v450_v52, %v451_v58 }
 0x354   : > { %v459_v62 = vmax.f32 %v457_v55, %v458_v59  ;;  %v442_v63 = vadd.f32 %v441_v60, %v440_v56  ;;  %v444_v3 = vmul.f32 0.25, %v435_v61 }
 0x356   : > { %653 = vmatprep.mubr.f32.mxu1 %v459_v62  ;;  %v445_v2 = vmul.f32 0.25, %v442_v63 }
 0x357   : > { %654 = vmatmul.mubr.f32.vlgmr.msra.gmra.mrb[2].mxu1 %v452_v1 }
 0x358   : > { %724 = vmatprep.mubr.f32.mxu0 %v445_v2 }
 0x359   : > { %725 = vmatmul.mubr.f32.vlgmr.msra.gmra.mrb[2].mxu0 %v444_v3 }
 0x42a   : > { %v655_v4 = vpop.f32.mrb[2].mxu1 }
 0x42b   : > { %v657_v5 = vpop.f32.mrb[3].mxu1 }
 0x42c   : > { %v726_v6 = vpop.f32.mrb[2].mxu0 }
 0x42d   : > { %v727_v7 = vadd.f32 %v726_v6, %v655_v4  ;;  %v728_v8 = vpop.f32.mrb[3].mxu0 }
 0x42e   : > { %v729_v9 = vadd.f32 %v728_v8, %v657_v5 }
 0x42f   : > { %v868_v10 = vmul.f32 -1.442695, %v727_v7 }
 0x430   : > { %v869_v11 = vmul.f32 -1.442695, %v729_v9 }
 0x431   : > { %1088 = vpow2.f32 %v868_v10 }
 0x432   : > { %1090 = vpow2.f32 %v869_v11 }
 0x43b   : > { %v1089_v12 = vpop.eup %1088 }
 0x43c   : > { %v1091_v13 = vpop.eup %1090  ;;  %v737_v14 = vadd.f32 1.0, %v1089_v12 }
 0x43d   : > { %v738_v15 = vadd.f32 1.0, %v1091_v13 }
 0x43e   : > { %1092 = vrcp.f32 %v737_v14 }
 0x43f   : > { %1094 = vrcp.f32 %v738_v15 }
 0x448   : > { %v1093_v17 = vpop.eup %1092 }
 0x449   : > { %v1095_v18 = vpop.eup %1094  ;;  %v746_v19 = vrot.slane %v1093_v17, %v745_v16 }
 0x44a   : > { %v750_v20 = vrot.slane %v1095_v18, %v745_v16 }
 0x44c   : > { %v753_v21 = vcombine.low %v746_v19, %v750_v20 }
 0x44e   : > { %v755_v22 = vmul.f32 %v753_v21, %v425_v36 }
 0x450   : > { %756 = vst [vmem:[%s228_s10] sm:$0xff] %v755_v22 }
 0x451   : > { %1167 = shalt.err (!%p1164_p7)
}
 0x452   : > { %s1168_s25 = scalar_lea.hbm %s1437_s5, 128  ;;  %s1172_s21 = scalar_lea.hbm %s1485_s4, 256 }
 0x453   : > { %p1169_p9 = scmp.ne.s32.totalorder %s1437_s5, %s1168_s25  ;;  %p1173_p0 = scmp.lt.u32.totalorder %s1437_s5, %s1485_s4 }
 0x454   : > { %p1174_p11 = scmp.lt.u32.totalorder %s1172_s21, %s1168_s25  ;;  %p1176_p4 = scmp.lt.u32.totalorder %s1168_s25, %s1437_s5 }
 0x455   : > { %p1170_p2 = pnand %p1169_p9, %p1350_p12 }
 0x456   : > { %p1175_p1 = por %p1174_p11, %p1173_p0 }
 0x457   : > { %p1171_p5 = pneg %p1170_p2 }
 0x458   : > { %p1177_p6 = por %p1176_p4, %p1175_p1 }
 0x45a   : > { %p1178_p8 = pnand %p1177_p6, %p1171_p5 }
 0x45c   : > { %1181 = shalt.err (!%p1178_p8)
}
 0x45d   : > { %1027 = dma.vmem_to_hbm [thread:$0]  (%p1350_p12), %s1439_s14, 128, %s1437_s5, %s758_s7  }
 0x45e PF: > { %s784_s28 = sand.u32 1, %s1212_s15   ;;  %p1500_p10 = scmp.ne.s32.totalorder %s1490_s22, 0 }
 0x45f   : > { %p1501_p13 = scmp.ge.s32.totalorder %s1224_s18, 2  ;;  %s785_s29 = scalar_lea.sflag [#allocation4], %s784_s28 }
 0x461   : > { %p1038_p3 = pnand %p1501_p13, %p1500_p10 }
 0x463   : > { %1207 = dma.done.wait (!%p1038_p3), %s785_s29, 128  }
 0x464   : > { %1209 = vsyncadd (!%p1038_p3), %s785_s29, 4294967168  ;;  %p18_p7 = scmp.ge.s32.totalorder %s1315_s27, 4   ;;  %s1502_s15 = smov %s1216_s16 }
 0x465   : > { %s1503_s16 = smov %s1220_s17  ;;  %s1504_s17 = smov %s1346_s24 }
 0x466   : > { %s1505_s18 = smov %s1315_s27  ;;  %20 = sbr.rel (!%p18_p7) target bundleno = 6 (0x6), region = 86 }
 0x46d   :  { %790 = vsyncpa [#allocation3], 1 }
 0x46e   :  { %792 = vsyncpa [#allocation3 + $0x1], 1 }
 0x46f   :  { %793 = vsyncpa [#allocation6], 1 }
 0x470   :  { %794 = vsyncpa [#allocation4], 1 }
 0x471   :  { %796 = vsyncpa [#allocation4 + $0x1], 1 }

</bundles_post_ra>
